<compile_context>
chip_gen: v5e
topology: v5e:2x2
jax: 0.10.0
libtpu: 0.0.40
codegen_flags: <defaults>
</compile_context>

<pallas_src>
import functools

import jax
import jax.numpy as jnp
from jax.experimental import pallas as pl
from jax.experimental.pallas import tpu as pltpu

EPS = 1e-5
OUTPUT_ACT = False     # matches CriticNet(output_act=False)
USE_BF16_MXU = False   # flip on v6e/v7x for large B/G; loosens the f32 tolerance


def _bn_relu(x, gamma, beta):
    # Training-mode BatchNorm1d (biased variance) fused with ReLU, single pass:
    #   var = max(E[x^2] - E[x]^2, 0) ;  scale = gamma * rsqrt(var + eps)
    #   out = relu(x * scale + (beta - mean * scale))
    mean = jnp.mean(x, axis=0, keepdims=True)
    mean_sq = jnp.mean(x * x, axis=0, keepdims=True)
    var = jnp.maximum(mean_sq - mean * mean, 0.0)
    scale = gamma * jax.lax.rsqrt(var + EPS)
    shift = beta - mean * scale
    return jnp.maximum(x * scale + shift, 0.0)


def critic_kernel(s_ref, a_ref, w_ref, bn_ref, out_ref, *,
                  S, A, H0, H1, out_dim, output_act, use_bf16):
    s = s_ref[...]                       # (B, S)
    a = a_ref[...]                       # (B, A)

    # Static views into the packed weight slab (no data movement at trace time).
    w1 = w_ref[0:S, 0:H0]
    w2h = w_ref[S:S + H0, 0:H1]
    w2a = w_ref[S + H0:S + H0 + A, 0:H1]

    if use_bf16:
        s_m, a_m = s.astype(jnp.bfloat16), a.astype(jnp.bfloat16)
        w1, w2h, w2a = (w.astype(jnp.bfloat16) for w in (w1, w2h, w2a))
    else:
        s_m, a_m = s, a

    # fc1 (bias omitted: exactly cancelled by BN mean subtraction) -> bn1 -> relu
    z1 = jnp.dot(s_m, w1, preferred_element_type=jnp.float32)
    h1 = _bn_relu(z1, bn_ref[0:1, 0:H0], bn_ref[1:2, 0:H0])

    # cat(h1, a) @ W2 == h1 @ W2_h + a @ W2_a   (bias omitted, BN-cancelled)
    h1_m = h1.astype(jnp.bfloat16) if use_bf16 else h1
    z2 = (jnp.dot(h1_m, w2h, preferred_element_type=jnp.float32)
          + jnp.dot(a_m, w2a, preferred_element_type=jnp.float32))
    h2 = _bn_relu(z2, bn_ref[2:3, 0:H1], bn_ref[3:4, 0:H1])

    # fc4
    if out_dim == 1:
        # VPU multiply + XLU lane reduce: avoids a 1-column MXU push on the tail.
        w4_row = bn_ref[5:6, 0:H1]
        b4 = bn_ref[4:5, 0:1]
        v = jnp.sum(h2 * w4_row, axis=-1, keepdims=True) + b4
    else:
        off = S + H0 + A
        w4 = w_ref[off:off + H1, 0:out_dim]
        b4 = bn_ref[4:5, 0:out_dim]
        h2_m = h2.astype(jnp.bfloat16) if use_bf16 else h2
        w4_m = w4.astype(jnp.bfloat16) if use_bf16 else w4
        v = jnp.dot(h2_m, w4_m, preferred_element_type=jnp.float32) + b4

    if output_act:
        v = jnp.maximum(v, 0.0)
    out_ref[...] = v.astype(out_ref.dtype)


def pack_params(params):
    """Pack all weights / per-feature vectors into two slabs (done once, not per call)."""
    w1, w2h, w2a, w4, b4 = (params[k] for k in ("w1", "w2h", "w2a", "w4", "b4"))
    S, H0 = w1.shape
    A, H1 = w2a.shape
    out_dim = w4.shape[1]
    hmax = max(H0, H1, out_dim)

    def padc(m):
        return jnp.pad(m, ((0, 0), (0, hmax - m.shape[1])))

    w_rows = [padc(w1), padc(w2h), padc(w2a)]
    if out_dim != 1:
        w_rows.append(padc(w4))
    w_slab = jnp.concatenate(w_rows, axis=0)

    bn_rows = [padc(params["g1"]), padc(params["be1"]),
               padc(params["g2"]), padc(params["be2"]),
               padc(b4)]
    if out_dim == 1:
        bn_rows.append(padc(w4.T))          # fc4 weight as a (1, H1) row
    else:
        bn_rows.append(jnp.zeros((1, hmax), jnp.float32))
    bn_slab = jnp.concatenate(bn_rows, axis=0)

    return {"w_slab": w_slab, "bn_slab": bn_slab,
            "dims": (S, A, H0, H1, out_dim)}


def critic_forward_grouped(full_s, full_a, packed, *,
                           output_act=OUTPUT_ACT, use_bf16=USE_BF16_MXU):
    """full_s: (G, B, S), full_a: (G, B, A) -> (G, B, out_dim). One pallas_call,
    grid over the G independent BatchNorm groups, weights VMEM-resident across steps."""
    G, B, S = full_s.shape
    A = full_a.shape[-1]
    S_, A_, H0, H1, out_dim = packed["dims"]
    assert (S, A) == (S_, A_), "input dims do not match packed params"

    w_slab = packed["w_slab"]
    bn_slab = packed["bn_slab"]

    kernel = functools.partial(
        critic_kernel, S=S, A=A, H0=H0, H1=H1, out_dim=out_dim,
        output_act=output_act, use_bf16=use_bf16)

    return pl.pallas_call(
        kernel,
        out_shape=jax.ShapeDtypeStruct((G, B, out_dim), jnp.float32),
        grid=(G,),
        in_specs=[
            pl.BlockSpec((None, B, S), lambda g: (g, 0, 0)),
            pl.BlockSpec((None, B, A), lambda g: (g, 0, 0)),
            # Constant index_map: weights are fetched once and stay VMEM-resident.
            pl.BlockSpec(w_slab.shape, lambda g: (0, 0)),
            pl.BlockSpec(bn_slab.shape, lambda g: (0, 0)),
        ],
        out_specs=pl.BlockSpec((None, B, out_dim), lambda g: (g, 0, 0)),
        compiler_params=pltpu.CompilerParams(
            dimension_semantics=("parallel",)),   # v7x: shard groups over both TCs
    )(full_s, full_a, w_slab, bn_slab)


def critic_forward(full_s, full_a, packed, **kw):
    """Single-call convenience wrapper: (B, S), (B, A) -> (B, out_dim)."""
    return critic_forward_grouped(full_s[None], full_a[None], packed, **kw)[0]


def init_params(key, state_dim, action_dim, hidden_dim, output_dim):
    h0, h1 = hidden_dim[0], hidden_dim[1]
    ks = jax.random.split(key, 6)

    # hidden_init in the reference uses weight.size()[0] (= out_features) as fan_in.
    lim1 = 1.0 / jnp.sqrt(h0)
    lim2 = 1.0 / jnp.sqrt(h1)

    w1 = jax.random.uniform(ks[0], (state_dim, h0), jnp.float32, -lim1, lim1)
    b1 = jax.random.uniform(ks[1], (1, h0), jnp.float32, -lim1, lim1)

    w2 = jax.random.uniform(ks[2], (h0 + action_dim, h1), jnp.float32, -lim2, lim2)
    b2 = jax.random.uniform(ks[3], (1, h1), jnp.float32, -lim2, lim2)

    w4 = jax.random.uniform(ks[4], (h1, output_dim), jnp.float32, -0.003, 0.003)
    b4 = jax.random.uniform(ks[5], (1, output_dim), jnp.float32, -0.003, 0.003)

    return {
        "w1": w1, "b1": b1,
        "g1": jnp.ones((1, h0), jnp.float32), "be1": jnp.zeros((1, h0), jnp.float32),
        "w2h": w2[:h0], "w2a": w2[h0:], "b2": b2,
        "g2": jnp.ones((1, h1), jnp.float32), "be2": jnp.zeros((1, h1), jnp.float32),
        "w4": w4, "b4": b4,
    }


def _batchnorm_train_ref(x, gamma, beta):
    mean = jnp.mean(x, axis=0, keepdims=True)
    var = jnp.mean((x - mean) * (x - mean), axis=0, keepdims=True)
    return (x - mean) * jax.lax.rsqrt(var + EPS) * gamma + beta


def reference_forward(full_s, full_a, p):
    # Pure-JAX reference of the PyTorch forward (training-mode batchnorm, with biases).
    z1 = full_s @ p["w1"] + p["b1"]
    h1 = jnp.maximum(_batchnorm_train_ref(z1, p["g1"], p["be1"]), 0.0)
    m1 = jnp.concatenate([h1, full_a], axis=-1)
    w2 = jnp.concatenate([p["w2h"], p["w2a"]], axis=0)
    z2 = m1 @ w2 + p["b2"]
    h2 = jnp.maximum(_batchnorm_train_ref(z2, p["g2"], p["be2"]), 0.0)
    v = h2 @ p["w4"] + p["b4"]
    if OUTPUT_ACT:
        v = jnp.maximum(v, 0.0)
    return v


if __name__ == "__main__":
    G = 2                      # independent BatchNorm groups (e.g. ensemble critics)
    B = 8
    full_state_dim = 48
    full_action_dim = 16
    hidden_dim = [64, 64]
    output_dim = 1

    key = jax.random.PRNGKey(0)
    k_s, k_a, k_p = jax.random.split(key, 3)

    full_s = jax.random.normal(k_s, (G, B, full_state_dim), jnp.float32)
    full_a = jax.random.normal(k_a, (G, B, full_action_dim), jnp.float32)
    params = init_params(k_p, full_state_dim, full_action_dim, hidden_dim, output_dim)
    packed = pack_params(params)

    out = critic_forward_grouped(full_s, full_a, packed)
    out = jax.block_until_ready(out)

    ref = jax.vmap(lambda s, a: reference_forward(s, a, params))(full_s, full_a)
    assert out.shape == (G, B, output_dim)
    assert jnp.allclose(out, ref, atol=1e-4, rtol=1e-4), "mismatch vs JAX reference"

    print("KERNEL_OK")
</pallas_src>

<mosaic_0001>
module attributes {stable_mosaic.version = 11 : i64} {
  func.func @critic_kernel(%arg0: i32, %arg1: memref<1x8x48xf32, #tpu.memory_space<vmem>>, %arg2: memref<1x8x16xf32, #tpu.memory_space<vmem>>, %arg3: memref<128x64xf32, #tpu.memory_space<vmem>>, %arg4: memref<6x64xf32, #tpu.memory_space<vmem>>, %arg5: memref<1x8x1xf32, #tpu.memory_space<vmem>>) attributes {dimension_semantics = [#tpu.dimension_semantics<parallel>], iteration_bounds = array<i64: 2>, scalar_prefetch = 0 : i64, scratch_operands = 0 : i64, tpu.core_type = #tpu.core_type<tc>, window_params = [{transform_indices = @transform_0, window_bounds = array<i64: 1, 8, 48>}, {transform_indices = @transform_1, window_bounds = array<i64: 1, 8, 16>}, {pipeline_mode = #tpu.pipeline_mode<synchronous>, transform_indices = @transform_2, window_bounds = array<i64: 128, 64>}, {pipeline_mode = #tpu.pipeline_mode<synchronous>, transform_indices = @transform_3, window_bounds = array<i64: 6, 64>}, {transform_indices = @transform_4, window_bounds = array<i64: 1, 8, 1>}]} {
    %c0 = arith.constant 0 : index
    %c0_0 = arith.constant 0 : index
    %c0_1 = arith.constant 0 : index
    %0 = vector.load %arg1[%c0, %c0_0, %c0_1] : memref<1x8x48xf32, #tpu.memory_space<vmem>>, vector<1x8x48xf32>
    %1 = vector.shape_cast %0 : vector<1x8x48xf32> to vector<8x48xf32>
    %c0_2 = arith.constant 0 : index
    %c0_3 = arith.constant 0 : index
    %c0_4 = arith.constant 0 : index
    %2 = vector.load %arg2[%c0_2, %c0_3, %c0_4] : memref<1x8x16xf32, #tpu.memory_space<vmem>>, vector<1x8x16xf32>
    %3 = vector.shape_cast %2 : vector<1x8x16xf32> to vector<8x16xf32>
    %c0_5 = arith.constant 0 : index
    %c0_6 = arith.constant 0 : index
    %4 = vector.load %arg3[%c0_5, %c0_6] : memref<128x64xf32, #tpu.memory_space<vmem>>, vector<48x64xf32>
    %c48 = arith.constant 48 : index
    %c0_7 = arith.constant 0 : index
    %5 = vector.load %arg3[%c48, %c0_7] : memref<128x64xf32, #tpu.memory_space<vmem>>, vector<64x64xf32>
    %c112 = arith.constant 112 : index
    %c0_8 = arith.constant 0 : index
    %6 = vector.load %arg3[%c112, %c0_8] : memref<128x64xf32, #tpu.memory_space<vmem>>, vector<16x64xf32>
    %cst = arith.constant dense<0.000000e+00> : vector<8x64xf32>
    %7 = tpu.matmul %1, %4, %cst {dimension_numbers = #tpu.dot_dimension_numbers<[1], [0], [0], [1], [0, 0, 1, 1], [], []>} : vector<8x48xf32>, vector<48x64xf32>, vector<8x64xf32> -> vector<8x64xf32>
    %c0_9 = arith.constant 0 : index
    %c0_10 = arith.constant 0 : index
    %8 = vector.load %arg4[%c0_9, %c0_10] : memref<6x64xf32, #tpu.memory_space<vmem>>, vector<1x64xf32>
    %c1 = arith.constant 1 : index
    %c0_11 = arith.constant 0 : index
    %9 = vector.load %arg4[%c1, %c0_11] : memref<6x64xf32, #tpu.memory_space<vmem>>, vector<1x64xf32>
    %cst_12 = arith.constant dense<0.000000e+00> : vector<64xf32>
    %10 = vector.multi_reduction <add>, %7, %cst_12 [0] : vector<8x64xf32> to vector<64xf32>
    %11 = vector.shape_cast %10 : vector<64xf32> to vector<1x64xf32>
    %cst_13 = arith.constant 8.000000e+00 : f32
    %12 = vector.broadcast %cst_13 : f32 to vector<1x64xf32>
    %13 = arith.divf %11, %12 : vector<1x64xf32>
    %14 = arith.mulf %7, %7 : vector<8x64xf32>
    %cst_14 = arith.constant dense<0.000000e+00> : vector<64xf32>
    %15 = vector.multi_reduction <add>, %14, %cst_14 [0] : vector<8x64xf32> to vector<64xf32>
    %16 = vector.shape_cast %15 : vector<64xf32> to vector<1x64xf32>
    %cst_15 = arith.constant 8.000000e+00 : f32
    %17 = vector.broadcast %cst_15 : f32 to vector<1x64xf32>
    %18 = arith.divf %16, %17 : vector<1x64xf32>
    %19 = arith.mulf %13, %13 : vector<1x64xf32>
    %20 = arith.subf %18, %19 : vector<1x64xf32>
    %cst_16 = arith.constant 0.000000e+00 : f32
    %21 = vector.broadcast %cst_16 : f32 to vector<1x64xf32>
    %22 = arith.maximumf %20, %21 : vector<1x64xf32>
    %cst_17 = arith.constant 9.99999974E-6 : f32
    %23 = vector.broadcast %cst_17 : f32 to vector<1x64xf32>
    %24 = arith.addf %22, %23 : vector<1x64xf32>
    %25 = math.rsqrt %24 : vector<1x64xf32>
    %26 = arith.mulf %8, %25 : vector<1x64xf32>
    %27 = arith.mulf %13, %26 : vector<1x64xf32>
    %28 = arith.subf %9, %27 : vector<1x64xf32>
    %29 = vector.broadcast %26 : vector<1x64xf32> to vector<8x64xf32>
    %30 = arith.mulf %7, %29 : vector<8x64xf32>
    %31 = vector.broadcast %28 : vector<1x64xf32> to vector<8x64xf32>
    %32 = arith.addf %30, %31 : vector<8x64xf32>
    %cst_18 = arith.constant 0.000000e+00 : f32
    %33 = vector.broadcast %cst_18 : f32 to vector<8x64xf32>
    %34 = arith.maximumf %32, %33 : vector<8x64xf32>
    %cst_19 = arith.constant dense<0.000000e+00> : vector<8x64xf32>
    %35 = tpu.matmul %34, %5, %cst_19 {dimension_numbers = #tpu.dot_dimension_numbers<[1], [0], [0], [1], [0, 0, 1, 1], [], []>} : vector<8x64xf32>, vector<64x64xf32>, vector<8x64xf32> -> vector<8x64xf32>
    %cst_20 = arith.constant dense<0.000000e+00> : vector<8x64xf32>
    %36 = tpu.matmul %3, %6, %cst_20 {dimension_numbers = #tpu.dot_dimension_numbers<[1], [0], [0], [1], [0, 0, 1, 1], [], []>} : vector<8x16xf32>, vector<16x64xf32>, vector<8x64xf32> -> vector<8x64xf32>
    %37 = arith.addf %35, %36 : vector<8x64xf32>
    %c2 = arith.constant 2 : index
    %c0_21 = arith.constant 0 : index
    %38 = vector.load %arg4[%c2, %c0_21] : memref<6x64xf32, #tpu.memory_space<vmem>>, vector<1x64xf32>
    %c3 = arith.constant 3 : index
    %c0_22 = arith.constant 0 : index
    %39 = vector.load %arg4[%c3, %c0_22] : memref<6x64xf32, #tpu.memory_space<vmem>>, vector<1x64xf32>
    %cst_23 = arith.constant dense<0.000000e+00> : vector<64xf32>
    %40 = vector.multi_reduction <add>, %37, %cst_23 [0] : vector<8x64xf32> to vector<64xf32>
    %41 = vector.shape_cast %40 : vector<64xf32> to vector<1x64xf32>
    %cst_24 = arith.constant 8.000000e+00 : f32
    %42 = vector.broadcast %cst_24 : f32 to vector<1x64xf32>
    %43 = arith.divf %41, %42 : vector<1x64xf32>
    %44 = arith.mulf %37, %37 : vector<8x64xf32>
    %cst_25 = arith.constant dense<0.000000e+00> : vector<64xf32>
    %45 = vector.multi_reduction <add>, %44, %cst_25 [0] : vector<8x64xf32> to vector<64xf32>
    %46 = vector.shape_cast %45 : vector<64xf32> to vector<1x64xf32>
    %cst_26 = arith.constant 8.000000e+00 : f32
    %47 = vector.broadcast %cst_26 : f32 to vector<1x64xf32>
    %48 = arith.divf %46, %47 : vector<1x64xf32>
    %49 = arith.mulf %43, %43 : vector<1x64xf32>
    %50 = arith.subf %48, %49 : vector<1x64xf32>
    %cst_27 = arith.constant 0.000000e+00 : f32
    %51 = vector.broadcast %cst_27 : f32 to vector<1x64xf32>
    %52 = arith.maximumf %50, %51 : vector<1x64xf32>
    %cst_28 = arith.constant 9.99999974E-6 : f32
    %53 = vector.broadcast %cst_28 : f32 to vector<1x64xf32>
    %54 = arith.addf %52, %53 : vector<1x64xf32>
    %55 = math.rsqrt %54 : vector<1x64xf32>
    %56 = arith.mulf %38, %55 : vector<1x64xf32>
    %57 = arith.mulf %43, %56 : vector<1x64xf32>
    %58 = arith.subf %39, %57 : vector<1x64xf32>
    %59 = vector.broadcast %56 : vector<1x64xf32> to vector<8x64xf32>
    %60 = arith.mulf %37, %59 : vector<8x64xf32>
    %61 = vector.broadcast %58 : vector<1x64xf32> to vector<8x64xf32>
    %62 = arith.addf %60, %61 : vector<8x64xf32>
    %cst_29 = arith.constant 0.000000e+00 : f32
    %63 = vector.broadcast %cst_29 : f32 to vector<8x64xf32>
    %64 = arith.maximumf %62, %63 : vector<8x64xf32>
    %c5 = arith.constant 5 : index
    %c0_30 = arith.constant 0 : index
    %65 = vector.load %arg4[%c5, %c0_30] : memref<6x64xf32, #tpu.memory_space<vmem>>, vector<1x64xf32>
    %c4 = arith.constant 4 : index
    %c0_31 = arith.constant 0 : index
    %66 = vector.load %arg4[%c4, %c0_31] : memref<6x64xf32, #tpu.memory_space<vmem>>, vector<1x1xf32>
    %67 = vector.broadcast %65 : vector<1x64xf32> to vector<8x64xf32>
    %68 = arith.mulf %64, %67 : vector<8x64xf32>
    %cst_32 = arith.constant dense<0.000000e+00> : vector<8xf32>
    %69 = vector.multi_reduction <add>, %68, %cst_32 [1] : vector<8x64xf32> to vector<8xf32>
    %70 = vector.shape_cast %69 : vector<8xf32> to vector<8x1xf32>
    %71 = vector.broadcast %66 : vector<1x1xf32> to vector<8x1xf32>
    %72 = arith.addf %70, %71 : vector<8x1xf32>
    %c0_33 = arith.constant 0 : index
    %c0_34 = arith.constant 0 : index
    %c0_35 = arith.constant 0 : index
    %73 = vector.load %arg5[%c0_33, %c0_34, %c0_35] : memref<1x8x1xf32, #tpu.memory_space<vmem>>, vector<1x8x1xf32>
    %74 = vector.shape_cast %73 : vector<1x8x1xf32> to vector<8x1xf32>
    %75 = vector.shape_cast %72 : vector<8x1xf32> to vector<1x8x1xf32>
    tpu.vector_store %arg5[%c0_33, %c0_34, %c0_35], %75 {strides = array<i32>} : memref<1x8x1xf32, #tpu.memory_space<vmem>>, vector<1x8x1xf32>,
    return
  }
  func.func @transform_0(%arg0: i32) -> (i32, i32, i32) {
    %c0_i32 = arith.constant 0 : i32
    %c0_i32_0 = arith.constant 0 : i32
    %c0_i32_1 = arith.constant 0 : i32
    return %arg0, %c0_i32, %c0_i32_0 : i32, i32, i32
  }
  func.func @transform_1(%arg0: i32) -> (i32, i32, i32) {
    %c0_i32 = arith.constant 0 : i32
    %c0_i32_0 = arith.constant 0 : i32
    %c0_i32_1 = arith.constant 0 : i32
    return %arg0, %c0_i32, %c0_i32_0 : i32, i32, i32
  }
  func.func @transform_2(%arg0: i32) -> (i32, i32) {
    %c0_i32 = arith.constant 0 : i32
    %c0_i32_0 = arith.constant 0 : i32
    %c0_i32_1 = arith.constant 0 : i32
    return %c0_i32, %c0_i32_0 : i32, i32
  }
  func.func @transform_3(%arg0: i32) -> (i32, i32) {
    %c0_i32 = arith.constant 0 : i32
    %c0_i32_0 = arith.constant 0 : i32
    %c0_i32_1 = arith.constant 0 : i32
    return %c0_i32, %c0_i32_0 : i32, i32
  }
  func.func @transform_4(%arg0: i32) -> (i32, i32, i32) {
    %c0_i32 = arith.constant 0 : i32
    %c0_i32_0 = arith.constant 0 : i32
    %c0_i32_1 = arith.constant 0 : i32
    return %arg0, %c0_i32, %c0_i32_0 : i32, i32, i32
  }
}

</mosaic_0001>

<bundles_post_ra>
// kernel: tpu_custom_call.1
= control target key start
LH: loop header
LB: loop body
LE: loop exit
PB: predicated region body
PF: predicated region fallthrough
CT: control target
= control target key end

     0   :  { %s529_s15 = smov 0   ;;  %s638_s0 = inlined_call_operand.vmem [shape: f32[2,8,48], index: 0, kind: input, shape index: {}]   ;;  %s639_s1 = inlined_call_operand.vmem [shape: f32[2,8,16], index: 1, kind: input, shape index: {}]   ;;  %s640_s2 = inlined_call_operand.vmem [shape: f32[128,64], index: 2, kind: input, shape index: {}]   ;;  %s641_s3 = inlined_call_operand.vmem [shape: f32[6,64], index: 3, kind: input, shape index: {}]   ;;  %s642_s4 = inlined_call_operand.vmem [shape: f32[2,8,1], index: 4, kind: output, shape index: {}]  }
   0x1 LB: > { %s465_s16 = sadd.s32 4294967295, %s501_s15   ;;  %p469_p0 = scmp.ge.s32.totalorder %s501_s15, 1  ;;  %s501_s15 = sphi %s529_s15, %s14_s15  }
   0x2   : > { %p170_p1 = scmp.lt.s32.totalorder %s501_s15, 3 }
   0x4   : > { %p171_p2 = pnand %p469_p0, %p170_p1 }
   0x5   : > { %p198_p3 = scmp.lt.s32.totalorder (!%p171_p2), %s465_s16, 1 }
   0x6   : > { %174 = sbr.rel (%p171_p2) target bundleno = 511 (0x1ff), region = 36 }
   0xb   : > { %v217_v0 = vld [vmem:[%s640_s2 + $0x28] sm:$0xff]  ;;  %v216_v1 = vld [vmem:[%s640_s2 + $0x20] sm:$0xff]  ;;  %v215_v2 = vld [vmem:[%s640_s2 + $0x18] sm:$0xff]  ;;  %s644_s16 = smov (!%p198_p3, %s465_s16), 1  ;;  %vm228_vm0 = vcmask 392192   ;;  %v503_v7 = vmov 8.0  }
   0xc   : > { %242 = vmatpush.msra.mxu0 %v217_v0  ;;  %v214_v3 = vld [vmem:[%s640_s2 + $0x10] sm:$0xff]  ;;  %s549_s25 = sshll.u32 %s644_s16, 3  ;;  %v213_v4 = vld [vmem:[%s640_s2 + $0x8] sm:$0xff]  ;;  %v212_v5 = vld [vmem:[%s640_s2] sm:$0xff]  ;;  %489 = vrcp.f32 %v503_v7  ;;  %vm254_vm1 = vcmask 523264   ;;  %vm301_vm3 = vcmask 130048  }
   0xd   : > { %s201_s30 = scalar_lea.vmem %s638_s0, %s549_s25  ;;  %v225_v21 = vld [vmem:[%s640_s2 + $0x68] sm:$0xff]  ;;  %v224_v25 = vld [vmem:[%s640_s2 + $0x60] sm:$0xff]  ;;  %v223_v28 = vld [vmem:[%s640_s2 + $0x58] sm:$0xff]  ;;  %s205_s27 = scalar_lea.vmem %s639_s1, %s549_s25  ;;  %vm398_vm10 = vcmask 7168  }
   0xe   : > { %243 = vmatpush.msra.mxu0 %v216_v1  ;;  %v210_v6 = vld [vmem:[%s201_s30] sm:$0xff]  ;;  %336 = vmatpush.msra.mxu2 %v225_v21  ;;  %v222_v32 = vld [vmem:[%s640_s2 + $0x50] sm:$0xff]  ;;  %v221_v35 = vld [vmem:[%s640_s2 + $0x48] sm:$0xff]  ;;  %s209_s21 = scalar_lea.vmem %s642_s4, %s549_s25 }
   0xf   : > { %v220_v38 = vld [vmem:[%s640_s2 + $0x40] sm:$0xff]  ;;  %v219_v40 = vld [vmem:[%s640_s2 + $0x38] sm:$0xff]  ;;  %v218_v41 = vld [vmem:[%s640_s2 + $0x30] sm:$0xff] }
  0x10   : > { %244 = vmatpush.msra.mxu0 %v215_v2  ;;  %337 = vmatpush.msra.mxu2 %v224_v25  ;;  %v227_v44 = vld [vmem:[%s640_s2 + $0x78] sm:$0xff]  ;;  %v226_v45 = vld [vmem:[%s640_s2 + $0x70] sm:$0xff]  ;;  %v211_v46 = vld [vmem:[%s205_s27] sm:$0xff] }
  0x11   : > { %319 = vmatpush.msra.mxu1 %v227_v44  ;;  %v252_v52 = vld [vmem:[%s641_s3] sm:$0x1]  ;;  %v253_v56 = vld [vmem:[%s641_s3 + $0x1] sm:$0x1]  ;;  %v488_v44 = vld [vmem:[%s641_s3 + $0x4] ss:$0 sm:$0xff] }
  0x12   : > { %245 = vmatpush.msra.mxu0 %v214_v3  ;;  %v490_v8 = vpop.eup %489  ;;  %338 = vmatpush.msra.mxu2 %v223_v28 }
  0x13   : > { %v263_v9 = vmul.f32 8.0, %v490_v8  ;;  %vm267_vm2 = vweird.f32 %v490_v8  ;;  %320 = vmatpush.msra.mxu1 %v226_v45 }
  0x14   : > { %246 = vmatpush.msra.mxu0 %v213_v4  ;;  %339 = vmatpush.msra.mxu2 %v222_v32 }
  0x15   : > { %v264_v10 = vsub.f32 1.0, %v263_v9  ;;  %474 = vmatmul.msk.f32.vlgmr.msra.gmra.mxu1 %vm301_vm3, %v211_v46 }
  0x16   : > { %247 = vmatpush.msra.mxu0 %v212_v5  ;;  %340 = vmatpush.msra.mxu2 %v221_v35 }
  0x17   : > { %473 = vmatmul.msk.f32.vlgmr.msra.gmra.mxu0 %vm228_vm0, %v210_v6  ;;  %v265_v15 = vmul.f32 %v490_v8, %v264_v10 }
  0x18   : > { %341 = vmatpush.msra.mxu2 %v220_v38 }
  0x19   : > { %v266_v22 = vadd.f32 %v490_v8, %v265_v15 }
  0x1a   : > { %342 = vmatpush.msra.mxu2 %v219_v40  ;;  %v487_v40 = vld [vmem:[%s641_s3 + $0x5] ss:$0 sm:$0xff] }
  0x1b   : > { %v577_v29 = vsel %vm267_vm2, %v490_v8, %v266_v22 }
  0x1c   : > { %343 = vmatpush.msra.mxu2 %v218_v41 }
  0x92   : > { %v322_v0 = vpop.f32.mrf.mxu1 }
  0x94   : > { %v561_v11 = vpop.f32.mrf.mxu0 }
  0x95   : > { %v255_v12 = vsel %vm254_vm1, %v561_v11, 0.0  ;;  %v270_v13 = vmul.f32 %v561_v11, %v561_v11 }
  0x96   : > { %v256_v14 = vrot.slane %v255_v12, 4 }
  0x97   : > { %v271_v16 = vsel %vm254_vm1, %v270_v13, 0.0 }
  0x98   : > { %v257_v17 = vadd.f32 %v256_v14, %v255_v12  ;;  %v272_v18 = vrot.slane %v271_v16, 4 }
  0x9a   : > { %v258_v19 = vrot.slane %v257_v17, 2  ;;  %v273_v20 = vadd.f32 %v272_v18, %v271_v16 }
  0x9c   : > { %v259_v23 = vadd.f32 %v258_v19, %v257_v17  ;;  %v274_v24 = vrot.slane %v273_v20, 2 }
  0x9e   : > { %v260_v26 = vrot.slane %v259_v23, 1  ;;  %v275_v27 = vadd.f32 %v274_v24, %v273_v20 }
  0xa0   : > { %v261_v30 = vadd.f32 %v260_v26, %v259_v23  ;;  %v276_v31 = vrot.slane %v275_v27, 1 }
  0xa2   : > { %v269_v33 = vmul.f32 %v577_v29, %v261_v30  ;;  %v277_v34 = vadd.f32 %v276_v31, %v275_v27  ;;  %v348_v30 = vld [vmem:[%s641_s3 + $0x2] sm:$0x1] }
  0xa4   : > { %v278_v36 = vmul.f32 %v277_v34, %v577_v29  ;;  %v279_v37 = vmul.f32 %v269_v33, %v269_v33 }
  0xa6   : > { %v280_v39 = vsub.f32 %v278_v36, %v279_v37 }
  0xa8   : > { %v281_v42 = vmax.f32 %v280_v39, 0.0 }
  0xaa   : > { %v282_v43 = vadd.f32 1e-05, %v281_v42 }
  0xac   : > { %491 = vrsqrt.f32 %v282_v43  ;;  %vm289_vm5 = vweird.f32 %v282_v43 }
  0xb2   : > { %v492_v47 = vpop.eup %491 }
  0xb3   : > { %v284_v48 = vmul.f32 %v492_v47, %v282_v43  ;;  %vm290_vm4 = vweird.f32 %v492_v47 }
  0xb4   : > { %vm291_vm6 = vmor %vm289_vm5, %vm290_vm4 }
  0xb5   : > { %v285_v49 = vmul.f32 %v492_v47, %v284_v48 }
  0xb7   : > { %v286_v50 = vmul.f32 0.5, %v285_v49 }
  0xb9   : > { %v287_v51 = vsub.f32 1.5, %v286_v50 }
  0xbb   : > { %v288_v53 = vmul.f32 %v492_v47, %v287_v51 }
  0xbd   : > { %v292_v54 = vsel %vm291_vm6, %v492_v47, %v288_v53 }
  0xbe   : > { %v293_v55 = vmul.f32 %v292_v54, %v252_v52 }
  0xc0   : > { %v294_v57 = vmul.f32 %v293_v55, %v269_v33  ;;  %v296_v58 = vperm.slane %v293_v55, 0  ;;  %v349_v33 = vld [vmem:[%s641_s3 + $0x3] sm:$0x1] }
  0xc2   : > { %v295_v59 = vsub.f32 %v253_v56, %v294_v57  ;;  %v297_v60 = vmul.f32 %v296_v58, %v561_v11 }
  0xc4   : > { %v298_v61 = vperm.slane %v295_v59, 0 }
  0xc6   : > { %v299_v62 = vadd.f32 %v298_v61, %v297_v60 }
  0xc8   : > { %v300_v63 = vmax.f32 %v299_v62, 0.0 }
  0xca   : > { %475 = vmatmul.msk.f32.vlgmr.msra.gmra.mxu2 %vm254_vm1, %v300_v63 }
 0x14d   : > { %v345_v1 = vpop.f32.mrf.mxu2 }
 0x14e   : > { %v346_v2 = vadd.f32 %v345_v1, %v322_v0 }
 0x150   : > { %v350_v3 = vsel %vm254_vm1, %v346_v2, 0.0  ;;  %v358_v4 = vmul.f32 %v346_v2, %v346_v2 }
 0x151   : > { %v351_v5 = vrot.slane %v350_v3, 4 }
 0x152   : > { %v359_v6 = vsel %vm254_vm1, %v358_v4, 0.0 }
 0x153   : > { %v352_v7 = vadd.f32 %v351_v5, %v350_v3  ;;  %v360_v8 = vrot.slane %v359_v6, 4 }
 0x155   : > { %v353_v9 = vrot.slane %v352_v7, 2  ;;  %v361_v10 = vadd.f32 %v360_v8, %v359_v6 }
 0x157   : > { %v354_v12 = vadd.f32 %v353_v9, %v352_v7  ;;  %v362_v11 = vrot.slane %v361_v10, 2 }
 0x159   : > { %v355_v13 = vrot.slane %v354_v12, 1  ;;  %v363_v14 = vadd.f32 %v362_v11, %v361_v10 }
 0x15b   : > { %v356_v15 = vadd.f32 %v355_v13, %v354_v12  ;;  %v364_v16 = vrot.slane %v363_v14, 1 }
 0x15d   : > { %v357_v17 = vmul.f32 %v356_v15, %v577_v29  ;;  %v365_v18 = vadd.f32 %v364_v16, %v363_v14 }
 0x15f   : > { %v366_v19 = vmul.f32 %v365_v18, %v577_v29  ;;  %v367_v20 = vmul.f32 %v357_v17, %v357_v17 }
 0x161   : > { %v368_v21 = vsub.f32 %v366_v19, %v367_v20 }
 0x163   : > { %v369_v22 = vmax.f32 %v368_v21, 0.0 }
 0x165   : > { %v370_v23 = vadd.f32 1e-05, %v369_v22 }
 0x167   : > { %493 = vrsqrt.f32 %v370_v23  ;;  %vm377_vm8 = vweird.f32 %v370_v23 }
 0x16d   : > { %v494_v24 = vpop.eup %493 }
 0x16e   : > { %v372_v25 = vmul.f32 %v494_v24, %v370_v23  ;;  %vm378_vm7 = vweird.f32 %v494_v24 }
 0x16f   : > { %vm379_vm9 = vmor %vm377_vm8, %vm378_vm7 }
 0x170   : > { %v373_v26 = vmul.f32 %v494_v24, %v372_v25 }
 0x172   : > { %v374_v27 = vmul.f32 0.5, %v373_v26 }
 0x174   : > { %v375_v28 = vsub.f32 1.5, %v374_v27 }
 0x176   : > { %v376_v31 = vmul.f32 %v494_v24, %v375_v28 }
 0x178   : > { %v380_v29 = vsel %vm379_vm9, %v494_v24, %v376_v31 }
 0x179   : > { %v381_v32 = vmul.f32 %v380_v29, %v348_v30 }
 0x17b   : > { %v384_v34 = vperm.slane %v381_v32, 0  ;;  %v382_v35 = vmul.f32 %v381_v32, %v357_v17 }
 0x17d   : > { %v383_v36 = vsub.f32 %v349_v33, %v382_v35  ;;  %v385_v37 = vmul.f32 %v384_v34, %v346_v2 }
 0x17f   : > { %v386_v38 = vperm.slane %v383_v36, 0 }
 0x181   : > { %v387_v39 = vadd.f32 %v386_v38, %v385_v37 }
 0x183   : > { %v388_v41 = vmax.f32 %v387_v39, 0.0 }
 0x185   : > { %v392_v42 = vmul.f32 %v487_v40, %v388_v41 }
 0x187   : > { %v393_v43 = vsel %vm254_vm1, %v392_v42, 0.0 }
 0x188   : > { %394 = vadd.xlane.f32.xlu0 %v393_v43 }
 0x1fb   : > { %v395_v45 = vpop.xlane.xlu0 %394 }
 0x1fc   : > { %v397_v46 = vadd.f32 %v488_v44, %v395_v45 }
 0x1fe   : > { %399 = vst.msk [vmem:[%s209_s21] sm:$0xff] %vm398_vm10, %v397_v46 }
 0x1ff PF: > { %s14_s15 = sadd.s32 1, %s501_s15  }
 0x200   : > { %p11_p4 = scmp.ge.s32.totalorder %s14_s15, 4  }
 0x202   :  { %13 = sbr.rel (!%p11_p4) target bundleno = 1 (0x1), region = 69 }

</bundles_post_ra>
